<compile_context>
chip_gen: v7x
topology: tpu7x:2x2x1
jax: 0.10.0
libtpu: 0.0.40
codegen_flags: <defaults>
</compile_context>

<pallas_src>
import functools

import jax
import jax.numpy as jnp
from jax import lax
from jax.experimental import pallas as pl
from jax.experimental.pallas import tpu as pltpu


def _ce_partial_kernel(logits_ref, tgt_ref, out_ref, *, hw):
    """Per-(batch, lane-tile) cross-entropy partial sums.

    logits_ref: (1, C, TM) logits tile — class dim on sublanes, spatial on lanes.
    tgt_ref:    (1, 1, TM) int32 targets.
    out_ref:    (1, 1, TM) float32 per-lane loss accumulator; same block for every
                step along the lane-tile grid axis (stays resident in VMEM).
    """
    j = pl.program_id(1)

    @pl.when(j == 0)
    def _():
        out_ref[...] = jnp.zeros_like(out_ref)

    logits = logits_ref[...].astype(jnp.float32)        # (1, C, TM)
    tgt = tgt_ref[...]                                  # (1, 1, TM)
    _, c, tm = logits.shape

    # Mask lanes past the true spatial extent (ragged last tile, no HBM pad)
    # and any negative targets.
    col = j * tm + lax.broadcasted_iota(jnp.int32, (1, 1, tm), 2)
    valid = (col < hw) & (tgt >= 0)

    # Numerically stable logsumexp over the class (sublane) axis — cheap
    # VPU/sublane work for typical segmentation class counts.
    mx = jnp.max(logits, axis=1, keepdims=True)                         # (1,1,TM)
    lse = mx + jnp.log(jnp.sum(jnp.exp(logits - mx), axis=1, keepdims=True))

    # One-hot gather of the target-class logit (no dynamic gather on TPU).
    cls = lax.broadcasted_iota(jnp.int32, (1, c, tm), 1)                # (1,C,TM)
    picked = jnp.sum(jnp.where(cls == tgt, logits, 0.0), axis=1, keepdims=True)

    # Elementwise, lane-dense accumulation; no per-step scalar reduce.
    out_ref[...] += jnp.where(valid, lse - picked, 0.0)


@functools.partial(jax.jit, static_argnames=("tile_m",))
def cross_entropy_loss_2d(outputs, targets, tile_m=None):
    """outputs: (N, C, H, W) float; targets: (N, 1, H, W) or (N, H, W) int.

    Returns scalar mean cross-entropy, matching
    nn.NLLLoss()(F.log_softmax(outputs, 1), targets.squeeze()).
    """
    n, c, h, w = outputs.shape
    hw = h * w

    # NCHW -> (N, C, H*W): a free, contiguous view (no transpose / extra HBM pass).
    # Keep the input dtype (bf16 stays bf16 on the wire); cast to f32 in-kernel.
    logits = outputs.reshape(n, c, hw)
    tgt = targets.reshape(n, 1, hw).astype(jnp.int32)

    # Pick the lane-tile size: as large as possible while keeping each
    # double-buffered logits block around ~2 MiB (safe on v5e/v6e/v7x VMEM).
    if tile_m is None:
        itemsize = jnp.dtype(outputs.dtype).itemsize
        budget_lanes = (2 * 1024 * 1024) // max(1, c * itemsize)
        max_tile = max(128, min(8192, (budget_lanes // 128) * 128))
    else:
        max_tile = tile_m

    if hw % 128 == 0:
        tm = min(max_tile, hw)
    elif hw <= max_tile:
        tm = hw              # full-extent lane block (allowed even if not %128)
    else:
        tm = max_tile        # ragged last block, masked in-kernel

    grid = (n, pl.cdiv(hw, tm))

    partials = pl.pallas_call(
        functools.partial(_ce_partial_kernel, hw=hw),
        out_shape=jax.ShapeDtypeStruct((n, 1, tm), jnp.float32),
        grid_spec=pltpu.PrefetchScalarGridSpec(
            num_scalar_prefetch=0,
            grid=grid,
            in_specs=[
                pl.BlockSpec((1, c, tm), lambda i, j: (i, 0, j)),
                pl.BlockSpec((1, 1, tm), lambda i, j: (i, 0, j)),
            ],
            out_specs=pl.BlockSpec((1, 1, tm), lambda i, j: (i, 0, 0)),
        ),
        compiler_params=pltpu.CompilerParams(
            # Batch axis independent -> megacore-shardable on v7x;
            # lane-tile axis carries the accumulator -> arbitrary.
            dimension_semantics=("parallel", "arbitrary"),
        ),
    )(logits, tgt)

    # TODO(synk): PyTorch NLLLoss with ignore_index would divide by the count of
    # non-ignored targets; the spec module uses plain NLLLoss, so divide by N*H*W.
    return jnp.sum(partials) / jnp.float32(n * hw)


def _reference(outputs, targets):
    """Pure-JAX reference for the same computation."""
    n, c, h, w = outputs.shape
    tgt = jnp.squeeze(targets).reshape(-1)
    logits = jnp.transpose(outputs, (0, 2, 3, 1)).reshape(-1, c).astype(jnp.float32)
    logp = jax.nn.log_softmax(logits, axis=-1)
    picked = jnp.take_along_axis(logp, tgt[:, None].astype(jnp.int32), axis=-1)[:, 0]
    return -jnp.mean(picked)


if __name__ == "__main__":
    key = jax.random.PRNGKey(0)
    k1, k2 = jax.random.split(key)

    N, C, H, W = 2, 4, 16, 16
    outputs = jax.random.normal(k1, (N, C, H, W), dtype=jnp.float32)
    targets = jax.random.randint(k2, (N, 1, H, W), 0, C, dtype=jnp.int32)

    loss = cross_entropy_loss_2d(outputs, targets)
    loss = jax.block_until_ready(loss)

    ref = _reference(outputs, targets)
    assert jnp.allclose(loss, ref, atol=1e-5, rtol=1e-5), (loss, ref)

    print("KERNEL_OK")
</pallas_src>

<mosaic_0001>
module attributes {stable_mosaic.version = 11 : i64} {
  func.func @_ce_partial_kernel(%arg0: i32, %arg1: i32, %arg2: memref<1x4x256xf32, #tpu.memory_space<vmem>>, %arg3: memref<1x1x256xi32, #tpu.memory_space<vmem>>, %arg4: memref<1x1x256xf32, #tpu.memory_space<vmem>>) attributes {dimension_semantics = [#tpu.dimension_semantics<parallel>, #tpu.dimension_semantics<arbitrary>], iteration_bounds = array<i64: 2, 1>, scalar_prefetch = 0 : i64, scratch_operands = 0 : i64, tpu.core_type = #tpu.core_type<tc>, window_params = [{transform_indices = @transform_0, window_bounds = array<i64: 1, 4, 256>}, {transform_indices = @transform_1, window_bounds = array<i64: 1, 1, 256>}, {transform_indices = @transform_2, window_bounds = array<i64: 1, 1, 256>}]} {
    %c0_i32 = arith.constant 0 : i32
    %0 = arith.cmpi eq, %arg1, %c0_i32 : i32
    %1 = arith.extui %0 : i1 to i32
    %c0_i32_0 = arith.constant 0 : i32
    %2 = arith.cmpi ne, %1, %c0_i32_0 : i32
    scf.if %2 {
      %cst_18 = arith.constant 0.000000e+00 : f32
      %36 = vector.broadcast %cst_18 : f32 to vector<1x1x256xf32>
      %c0_19 = arith.constant 0 : index
      %c0_20 = arith.constant 0 : index
      %c0_21 = arith.constant 0 : index
      %37 = vector.load %arg4[%c0_19, %c0_20, %c0_21] : memref<1x1x256xf32, #tpu.memory_space<vmem>>, vector<1x1x256xf32>
      tpu.vector_store %arg4[%c0_19, %c0_20, %c0_21], %36 {strides = array<i32>} : memref<1x1x256xf32, #tpu.memory_space<vmem>>, vector<1x1x256xf32>,
    } else {
    }
    %c0 = arith.constant 0 : index
    %c0_1 = arith.constant 0 : index
    %c0_2 = arith.constant 0 : index
    %3 = vector.load %arg2[%c0, %c0_1, %c0_2] : memref<1x4x256xf32, #tpu.memory_space<vmem>>, vector<1x4x256xf32>
    %c0_3 = arith.constant 0 : index
    %c0_4 = arith.constant 0 : index
    %c0_5 = arith.constant 0 : index
    %4 = vector.load %arg3[%c0_3, %c0_4, %c0_5] : memref<1x1x256xi32, #tpu.memory_space<vmem>>, vector<1x1x256xi32>
    %c256_i32 = arith.constant 256 : i32
    %5 = arith.muli %arg1, %c256_i32 : i32
    %6 = tpu.iota {dimensions = array<i32: 2>} : vector<1x1x256xi32>
    %7 = vector.broadcast %5 : i32 to vector<1x1x256xi32>
    %8 = arith.addi %7, %6 : vector<1x1x256xi32>
    %c256_i32_6 = arith.constant 256 : i32
    %9 = vector.broadcast %c256_i32_6 : i32 to vector<1x1x256xi32>
    %10 = arith.cmpi slt, %8, %9 : vector<1x1x256xi32>
    %c0_i32_7 = arith.constant 0 : i32
    %11 = vector.broadcast %c0_i32_7 : i32 to vector<1x1x256xi32>
    %12 = arith.cmpi sge, %4, %11 : vector<1x1x256xi32>
    %13 = arith.andi %10, %12 : vector<1x1x256xi1>
    %cst = arith.constant dense<0xFF800000> : vector<1x256xf32>
    %14 = vector.multi_reduction <maximumf>, %3, %cst [1] : vector<1x4x256xf32> to vector<1x256xf32>
    %15 = vector.shape_cast %14 : vector<1x256xf32> to vector<1x1x256xf32>
    %16 = vector.broadcast %15 : vector<1x1x256xf32> to vector<1x4x256xf32>
    %17 = arith.subf %3, %16 : vector<1x4x256xf32>
    %18 = math.exp %17 : vector<1x4x256xf32>
    %cst_8 = arith.constant dense<0.000000e+00> : vector<1x256xf32>
    %19 = vector.multi_reduction <add>, %18, %cst_8 [1] : vector<1x4x256xf32> to vector<1x256xf32>
    %20 = vector.shape_cast %19 : vector<1x256xf32> to vector<1x1x256xf32>
    %21 = math.log %20 : vector<1x1x256xf32>
    %22 = arith.addf %15, %21 : vector<1x1x256xf32>
    %23 = tpu.iota {dimensions = array<i32: 1>} : vector<1x4x256xi32>
    %24 = vector.broadcast %4 : vector<1x1x256xi32> to vector<1x4x256xi32>
    %25 = arith.cmpi eq, %23, %24 : vector<1x4x256xi32>
    %cst_9 = arith.constant 0.000000e+00 : f32
    %26 = vector.broadcast %cst_9 : f32 to vector<1x4x256xf32>
    %27 = arith.select %25, %3, %26 : vector<1x4x256xi1>, vector<1x4x256xf32>
    %cst_10 = arith.constant dense<0.000000e+00> : vector<1x256xf32>
    %28 = vector.multi_reduction <add>, %27, %cst_10 [1] : vector<1x4x256xf32> to vector<1x256xf32>
    %29 = vector.shape_cast %28 : vector<1x256xf32> to vector<1x1x256xf32>
    %c0_11 = arith.constant 0 : index
    %c0_12 = arith.constant 0 : index
    %c0_13 = arith.constant 0 : index
    %30 = vector.load %arg4[%c0_11, %c0_12, %c0_13] : memref<1x1x256xf32, #tpu.memory_space<vmem>>, vector<1x1x256xf32>
    %31 = arith.subf %22, %29 : vector<1x1x256xf32>
    %cst_14 = arith.constant 0.000000e+00 : f32
    %32 = vector.broadcast %cst_14 : f32 to vector<1x1x256xf32>
    %33 = arith.select %13, %31, %32 : vector<1x1x256xi1>, vector<1x1x256xf32>
    %34 = arith.addf %30, %33 : vector<1x1x256xf32>
    %c0_15 = arith.constant 0 : index
    %c0_16 = arith.constant 0 : index
    %c0_17 = arith.constant 0 : index
    %35 = vector.load %arg4[%c0_15, %c0_16, %c0_17] : memref<1x1x256xf32, #tpu.memory_space<vmem>>, vector<1x1x256xf32>
    tpu.vector_store %arg4[%c0_15, %c0_16, %c0_17], %34 {strides = array<i32>} : memref<1x1x256xf32, #tpu.memory_space<vmem>>, vector<1x1x256xf32>,
    return
  }
  func.func @transform_0(%arg0: i32, %arg1: i32) -> (i32, i32, i32) {
    %c0_i32 = arith.constant 0 : i32
    %c0_i32_0 = arith.constant 0 : i32
    return %arg0, %c0_i32, %arg1 : i32, i32, i32
  }
  func.func @transform_1(%arg0: i32, %arg1: i32) -> (i32, i32, i32) {
    %c0_i32 = arith.constant 0 : i32
    %c0_i32_0 = arith.constant 0 : i32
    return %arg0, %c0_i32, %arg1 : i32, i32, i32
  }
  func.func @transform_2(%arg0: i32, %arg1: i32) -> (i32, i32, i32) {
    %c0_i32 = arith.constant 0 : i32
    %c0_i32_0 = arith.constant 0 : i32
    %c0_i32_1 = arith.constant 0 : i32
    return %arg0, %c0_i32, %c0_i32_0 : i32, i32, i32
  }
}

</mosaic_0001>

<bundles_post_ra>
// kernel: cross_entropy_loss_2d.1
= control target key start
LH: loop header
LB: loop body
LE: loop exit
PB: predicated region body
PF: predicated region fallthrough
CT: control target
= control target key end

     0   :  { %s512_s9 = smov 0   ;;  %s514_s10 = smov 0   ;;  %s578_s0 = inlined_call_operand.vmem [shape: f32[2,4,256], index: 0, kind: input, shape index: {}]   ;;  %s579_s1 = inlined_call_operand.vmem [shape: s32[2,1,256], index: 1, kind: input, shape index: {}]   ;;  %s580_s2 = inlined_call_operand.vmem [shape: f32[2,1,256], index: 2, kind: output, shape index: {}]  }
   0x1   :  { %s516_s11 = smov 0  }
   0x2 LB: > { %s24_s12 = sadd.s32 1, %s488_s10  ;;  %p428_p0 = scmp.ge.s32.totalorder %s492_s11, 1  ;;  %s492_s11 = sphi %s516_s11, %s12_s11   ;;  %s488_s10 = sphi %s514_s10, %s584_s10   ;;  %s484_s9 = sphi %s512_s9, %s583_s9  }
   0x3   : > { %p26_p1 = scmp.ge.s32.totalorder %s24_s12, 2  ;;  %p147_p2 = scmp.lt.s32.totalorder %s492_s11, 3 }
   0x5   : > { %s586_s12 = smov (%p26_p1, %s24_s12), 0  ;;  %p148_p3 = pnand %p428_p0, %p147_p2 }
   0x6   : > { %p181_p4 = scmp.lt.s32.totalorder (!%p148_p3), %s484_s9, 1  ;;  %v207_v0 = vlaneseq (!%p148_p3)  ;;  %vm240_vm1 = vcmask (!%p148_p3), 1043456   ;;  %v494_v3 = vmov (!%p148_p3), 0.0   ;;  %v495_v56 = vmov (!%p148_p3), 0  }
   0x7   : > { %151 = sbr.rel (%p148_p3) target bundleno = 92 (0x5c), region = 28  ;;  %v496_v62 = vmov (!%p148_p3), 1966171168  }
   0x8   : > { %vm533_vm0 = vcmp.lt.s32.totalorder (!%p148_p3), %v207_v0, 256  ;;  %v551_v19 = vshrl.u32 (!%p148_p3), %v207_v0, 7  ;;  %v322_v63 = vunpack.c.l.s4 (!%p148_p3), %v496_v62 }
   0xa   : > { %v227_v22 = vsub.s32 (!%p148_p3), 0, %v551_v19  ;;  %v231_v25 = vsub.s32 (!%p148_p3), 1, %v551_v19 }
   0xe   : > { %s588_s9 = smov (!%p181_p4, %s484_s9), 1 }
   0xf   : > { %s435_s13 = sshll.u32 %s588_s9, 3  ;;  %s431_s17 = sshll.u32 %s588_s9, 1 }
  0x10   : > { %s188_s16 = scalar_lea.vmem %s578_s0, %s435_s13  ;;  %s544_s20 = scalar_lea.vmem %s580_s2, %s431_s17 }
  0x11   : > { %v212_v2 = vld [vmem:[%s188_s16] sm:$0xff]  ;;  %211 = vst.msk [vmem:[%s544_s20] sm:$0x3] %vm533_vm0, %v494_v3  ;;  %s197_s23 = scalar_lea.vmem %s579_s1, %s431_s17 }
  0x12   : > { %v238_v4 = vcombine.high %v212_v2, %v212_v2  ;;  %v241_v5 = vsel %vm240_vm1, %v212_v2, -inf  ;;  %v213_v24 = vld [vmem:[%s197_s23] sm:$0x3] }
  0x13   : > { %v242_v6 = vrot.slane %v241_v5, 4  ;;  %v290_v26 = vrot.slane %v213_v24, %v227_v22  ;;  %v294_v27 = vrot.slane %v213_v24, %v231_v25  ;;  %vm223_vm4 = vcmp.ge.s32.totalorder %v213_v24, 0 }
  0x14   : > { %v248_v7 = vsel %vm240_vm1, %v238_v4, -inf  ;;  %v224_v57 = vsel %vm223_vm4, 1, %v495_v56 }
  0x15   : > { %v243_v8 = vmax.f32 %v241_v5, %v242_v6  ;;  %v249_v9 = vrot.slane %v248_v7, 4  ;;  %vm295_vm2 = vcmp.eq.s32.totalorder %v551_v19, %v290_v26  ;;  %vm296_vm3 = vcmp.eq.s32.totalorder %v551_v19, %v294_v27 }
  0x16   : > { %v297_v28 = vsel %vm295_vm2, %v212_v2, 0.0  ;;  %v298_v32 = vsel %vm296_vm3, %v238_v4, 0.0  ;;  %v228_v61 = vrot.slane %v224_v57, %v227_v22  ;;  %v232_v4 = vrot.slane %v224_v57, %v231_v25 }
  0x17   : > { %v244_v10 = vrot.slane %v243_v8, 2  ;;  %v250_v11 = vmax.f32 %v248_v7, %v249_v9  ;;  %v299_v34 = vsel %vm240_vm1, %v297_v28, 0.0  ;;  %v306_v38 = vsel %vm240_vm1, %v298_v32, 0.0 }
  0x18   : > { %v300_v39 = vrot.slane %v299_v34, 4  ;;  %v307_v42 = vrot.slane %v306_v38, 4  ;;  %vm233_vm5 = vcmp.ne.s32.totalorder %v228_v61, 0  ;;  %vm234_vm6 = vcmp.ne.s32.totalorder %v232_v4, 0 }
  0x19   : > { %v245_v12 = vmax.f32 %v243_v8, %v244_v10  ;;  %v251_v13 = vrot.slane %v250_v11, 2  ;;  %v323_v8 = vunpack.c.0.s8 %v322_v63 }
  0x1a   : > { %v301_v45 = vadd.f32 %v300_v39, %v299_v34  ;;  %v308_v48 = vadd.f32 %v307_v42, %v306_v38 }
  0x1b   : > { %v246_v14 = vrot.slane %v245_v12, 1  ;;  %v252_v15 = vmax.f32 %v250_v11, %v251_v13  ;;  %v326_v13 = vsub.s32 %v323_v8, %v551_v19 }
  0x1c   : > { %v302_v51 = vrot.slane %v301_v45, 2  ;;  %v309_v53 = vrot.slane %v308_v48, 2 }
  0x1d   : > { %v247_v16 = vmax.f32 %v245_v12, %v246_v14  ;;  %v253_v17 = vrot.slane %v252_v15, 1 }
  0x1e   : > { %v303_v54 = vadd.f32 %v302_v51, %v301_v45  ;;  %v310_v55 = vadd.f32 %v309_v53, %v308_v48 }
  0x1f   : > { %v254_v18 = vmax.f32 %v252_v15, %v253_v17 }
  0x20   : > { %v304_v58 = vrot.slane %v303_v54, 1  ;;  %v311_v59 = vrot.slane %v310_v55, 1 }
  0x21   : > { %v257_v20 = vcombine.low %v247_v16, %v254_v18 }
  0x22   : > { %v312_v7 = vadd.f32 %v311_v59, %v310_v55 }
  0x23   : > { %v259_v21 = vsub.f32 %v212_v2, %v257_v20  ;;  %v305_v2 = vadd.f32 %v304_v58, %v303_v54  ;;  %v313_v20 = vld [vmem:[%s544_s20] sm:$0x3] }
  0x25   : > { %v260_v23 = vmul.f32 1.442695, %v259_v21 }
  0x27   : > { %464 = vpow2.f32 %v260_v23 }
  0x31   : > { %v465_v29 = vpop.eup %464 }
  0x32   : > { %v263_v30 = vcombine.high %v465_v29, %v465_v29  ;;  %v265_v31 = vsel %vm240_vm1, %v465_v29, 0.0 }
  0x33   : > { %v266_v33 = vrot.slane %v265_v31, 4 }
  0x34   : > { %v272_v35 = vsel %vm240_vm1, %v263_v30, 0.0 }
  0x35   : > { %v267_v36 = vadd.f32 %v266_v33, %v265_v31  ;;  %v273_v37 = vrot.slane %v272_v35, 4 }
  0x37   : > { %v268_v40 = vrot.slane %v267_v36, 2  ;;  %v274_v41 = vadd.f32 %v273_v37, %v272_v35 }
  0x39   : > { %v269_v43 = vadd.f32 %v268_v40, %v267_v36  ;;  %v275_v44 = vrot.slane %v274_v41, 2 }
  0x3b   : > { %v270_v46 = vrot.slane %v269_v43, 1  ;;  %v276_v47 = vadd.f32 %v275_v44, %v274_v41 }
  0x3d   : > { %v271_v49 = vadd.f32 %v270_v46, %v269_v43  ;;  %v277_v50 = vrot.slane %v276_v47, 1 }
  0x3f   : > { %v278_v52 = vadd.f32 %v277_v50, %v276_v47  ;;  %466 = vlog2.f32 %v271_v49 }
  0x41   : > { %468 = vlog2.f32 %v278_v52 }
  0x49   : > { %v467_v60 = vpop.eup %466 }
  0x4a   : > { %v280_v0 = vmul.f32 0.6931472, %v467_v60 }
  0x4b   : > { %v469_v3 = vpop.eup %468 }
  0x4c   : > { %v282_v5 = vmul.f32 0.6931472, %v469_v3  ;;  %v283_v6 = vadd.f32 %v280_v0, %v247_v16 }
  0x4e   : > { %v284_v9 = vadd.f32 %v282_v5, %v254_v18  ;;  %v314_v10 = vsub.f32 %v283_v6, %v305_v2 }
  0x50   : > { %v315_v11 = vsub.f32 %v284_v9, %v312_v7  ;;  %v316_v12 = vsel %vm233_vm5, %v314_v10, 0.0 }
  0x52   : > { %v317_v14 = vsel %vm234_vm6, %v315_v11, 0.0 }
  0x53   : > { %v320_v15 = vcombine.low %v316_v12, %v317_v14 }
  0x55   : > { %v327_v17 = vrot.slane %v320_v15, %v326_v13 }
  0x57   : > { %v334_v21 = vrot.slane %v327_v17, %v326_v13 }
  0x59   : > { %v336_v22 = vadd.f32 %v334_v21, %v313_v20 }
  0x5b   : > { %341 = vst.msk [vmem:[%s544_s20] sm:$0x3] %vm533_vm0, %v336_v22 }
  0x5c PF: > { %s12_s11 = sadd.s32 1, %s492_s11   ;;  %s583_s9 = smov %s488_s10 }
  0x5d   : > { %p9_p5 = scmp.ge.s32.totalorder %s12_s11, 4   ;;  %s584_s10 = smov %s586_s12 }
  0x5f   :  { %11 = sbr.rel (!%p9_p5) target bundleno = 2 (0x2), region = 65 }

</bundles_post_ra>
